<compile_context>
chip_gen: v7x
topology: tpu7x:2x2x1
jax: 0.10.0
libtpu: 0.0.40
codegen_flags: <defaults>
</compile_context>

<pallas_src>
import math

import jax
import jax.numpy as jnp
from jax.experimental import pallas as pl
from jax.experimental.pallas import tpu as pltpu

H_IN = 64
K, STRIDE, PAD = 6, 6, 4
H1 = (H_IN + 2 * PAD - K) // STRIDE + 1      # 12 (first conv06 output length)
H2 = (H1 + 2 * PAD - K) // STRIDE + 1        # 3  (second conv06 output length)
SUBLANE = 8
MAX_TB = 1024                                # batch tile (rows per grid step)


def _tap_matrix(w6, rows, cols):
    """(rows, cols) matrix M with M[h, i] = w6[h + PAD - STRIDE*i] (else 0).

    x @ M == strided, zero-padded 1-D cross-correlation of x with w6
    (conv06 minus its bias); the conv's zero padding is folded into the mask.
    Built once in the wrapper (plain JAX), never inside the kernel.
    """
    h = jnp.arange(rows, dtype=jnp.int32)[:, None]
    i = jnp.arange(cols, dtype=jnp.int32)[None, :]
    tap = h + PAD - STRIDE * i
    valid = (tap >= 0) & (tap < K)
    return jnp.where(valid, w6[jnp.clip(tap, 0, K - 1)], 0.0).astype(jnp.float32)


def model_kernel(x_ref, m_ref, b_ref, o_ref):
    # One MXU dot (f32 HIGHEST, multi-pass but nowhere near the bottleneck),
    # bias add, clamp, scale.  All vreg-resident, no scratch.
    y = jnp.dot(x_ref[...], m_ref[...],
                preferred_element_type=jnp.float32,
                precision=jax.lax.Precision.HIGHEST) + b_ref[...]
    o_ref[...] = jnp.clip(y, 0.0, 6.0) * (1.0 / 6.0)


def forward(x_nchw, w6, b6, w1, b1):
    n, c, h, w = x_nchw.shape
    assert (c, h, w) == (1, H_IN, 1)
    x2d = x_nchw.reshape(n, H_IN).astype(jnp.float32)

    w6v = w6.reshape(K).astype(jnp.float32)
    b6s = b6.reshape(()).astype(jnp.float32)
    w1s = w1.reshape(()).astype(jnp.float32)
    b1s = b1.reshape(()).astype(jnp.float32)

    # Fold the entire affine pipeline into one matrix + bias (exact for a
    # 1-in/1-out-channel conv01):
    #   stage: z = x @ M_tap + b6 ; y = w1*z + d     with d = 0.3*w1 + b1 + 2.5
    #   =>  out_pre = w1^2 * (x @ M1 @ M2) + w1*((w1*b6 + d)*colsum(M2) + b6) + d
    m1 = _tap_matrix(w6v, H_IN, H1)                                # (64, 12)
    m2 = _tap_matrix(w6v, H1, H2)                                  # (12, 3)
    d = 0.3 * w1s + b1s + 2.5
    cst = w1s * b6s + d
    fused_m = (w1s * w1s) * jnp.matmul(
        m1, m2, precision=jax.lax.Precision.HIGHEST)               # (64, 3)
    fused_b = (w1s * (cst * jnp.sum(m2, axis=0) + b6s) + d).reshape(1, H2)

    # Batch tiling: TB rows per grid step (ragged last block handled by Pallas).
    tb = max(SUBLANE, min(MAX_TB, ((n + SUBLANE - 1) // SUBLANE) * SUBLANE))
    grid = (pl.cdiv(n, tb),)

    out = pl.pallas_call(
        model_kernel,
        out_shape=jax.ShapeDtypeStruct((n, H2), jnp.float32),
        grid=grid,
        in_specs=[
            pl.BlockSpec((tb, H_IN), lambda i: (i, 0)),   # x tile (pipelined)
            pl.BlockSpec((H_IN, H2), lambda i: (0, 0)),   # fused matrix (resident)
            pl.BlockSpec((1, H2),    lambda i: (0, 0)),   # fused bias   (resident)
        ],
        out_specs=pl.BlockSpec((tb, H2), lambda i: (i, 0)),
        compiler_params=pltpu.CompilerParams(
            dimension_semantics=("parallel",)),           # megacore on v7x
    )(x2d, fused_m, fused_b)
    return out.reshape(n, 1, H2, 1)


def ref_forward(x_nchw, w6, b6, w1, b1):
    """Pure-JAX reference of the PyTorch forward pass (windowed convs)."""
    n = x_nchw.shape[0]
    x = x_nchw.reshape(n, H_IN).astype(jnp.float32)
    w6v = w6.reshape(K)
    b6s = b6.reshape(())
    w1s = w1.reshape(())
    b1s = b1.reshape(())

    def conv06(v):                            # v: (n, L)
        L = v.shape[1]
        n_out = (L + 2 * PAD - K) // STRIDE + 1
        vp = jnp.pad(v, ((0, 0), (PAD, PAD)))
        wins = jnp.stack([vp[:, i * STRIDE:i * STRIDE + K] for i in range(n_out)],
                         axis=1)              # (n, n_out, K)
        return jnp.einsum("nok,k->no", wins, w6v,
                          precision=jax.lax.Precision.HIGHEST) + b6s

    y = conv06(x)
    y = (y + 0.3) * w1s + b1s + 2.5
    y = conv06(y)
    y = (y + 0.3) * w1s + b1s + 2.5
    y = jnp.clip(y, 0.0, 6.0) / 6.0
    return y.reshape(n, 1, H2, 1)


if __name__ == "__main__":
    key = jax.random.PRNGKey(0)
    kx, k1, k2, k3, k4, kx2 = jax.random.split(key, 6)

    # Deterministic parameter init (PyTorch-default-style uniform bounds).
    bound6 = 1.0 / math.sqrt(K)                                   # conv06 fan_in = 6
    w6 = jax.random.uniform(k1, (K,), jnp.float32, -bound6, bound6)
    b6 = jax.random.uniform(k2, (1,), jnp.float32, -bound6, bound6)
    w1 = jax.random.uniform(k3, (1,), jnp.float32, -1.0, 1.0)     # conv01 fan_in = 1
    b1 = jax.random.uniform(k4, (1,), jnp.float32, -1.0, 1.0)

    fwd = jax.jit(forward)

    # Shape from the spec: (1, 1, 64, 1).
    x = jax.random.normal(kx, (1, 1, H_IN, 1), dtype=jnp.float32)
    y = fwd(x, w6, b6, w1, b1)
    jax.block_until_ready(y)
    y_ref = ref_forward(x, w6, b6, w1, b1)
    assert y.shape == (1, 1, H2, 1)
    assert jnp.allclose(y, y_ref, atol=1e-5, rtol=1e-5), (y, y_ref)

    # Small ragged batch to exercise the grid / masked last block.
    x_b = jax.random.normal(kx2, (19, 1, H_IN, 1), dtype=jnp.float32)
    y_b = fwd(x_b, w6, b6, w1, b1)
    jax.block_until_ready(y_b)
    y_b_ref = ref_forward(x_b, w6, b6, w1, b1)
    assert y_b.shape == (19, 1, H2, 1)
    assert jnp.allclose(y_b, y_b_ref, atol=1e-5, rtol=1e-5)

    print("KERNEL_OK")
</pallas_src>

<mosaic_0001>
module attributes {stable_mosaic.version = 11 : i64} {
  func.func @model_kernel(%arg0: i32, %arg1: memref<8x64xf32, #tpu.memory_space<vmem>>, %arg2: memref<64x3xf32, #tpu.memory_space<vmem>>, %arg3: memref<1x3xf32, #tpu.memory_space<vmem>>, %arg4: memref<8x3xf32, #tpu.memory_space<vmem>>) attributes {dimension_semantics = [#tpu.dimension_semantics<parallel>], iteration_bounds = array<i64: 1>, scalar_prefetch = 0 : i64, scratch_operands = 0 : i64, tpu.core_type = #tpu.core_type<tc>, window_params = [{transform_indices = @transform_0, window_bounds = array<i64: 8, 64>}, {pipeline_mode = #tpu.pipeline_mode<synchronous>, transform_indices = @transform_1, window_bounds = array<i64: 64, 3>}, {pipeline_mode = #tpu.pipeline_mode<synchronous>, transform_indices = @transform_2, window_bounds = array<i64: 1, 3>}, {transform_indices = @transform_3, window_bounds = array<i64: 8, 3>}]} {
    %c0 = arith.constant 0 : index
    %c0_0 = arith.constant 0 : index
    %0 = vector.load %arg1[%c0, %c0_0] : memref<8x64xf32, #tpu.memory_space<vmem>>, vector<8x64xf32>
    %c0_1 = arith.constant 0 : index
    %c0_2 = arith.constant 0 : index
    %1 = vector.load %arg2[%c0_1, %c0_2] : memref<64x3xf32, #tpu.memory_space<vmem>>, vector<64x3xf32>
    %cst = arith.constant dense<0.000000e+00> : vector<8x3xf32>
    %2 = tpu.matmul %0, %1, %cst {dimension_numbers = #tpu.dot_dimension_numbers<[1], [0], [0], [1], [0, 0, 1, 1], [], []>, precision = #tpu.contract_precision<fp32>} : vector<8x64xf32>, vector<64x3xf32>, vector<8x3xf32> -> vector<8x3xf32>
    %c0_3 = arith.constant 0 : index
    %c0_4 = arith.constant 0 : index
    %3 = vector.load %arg3[%c0_3, %c0_4] : memref<1x3xf32, #tpu.memory_space<vmem>>, vector<1x3xf32>
    %4 = vector.broadcast %3 : vector<1x3xf32> to vector<8x3xf32>
    %5 = arith.addf %2, %4 : vector<8x3xf32>
    %cst_5 = arith.constant 0.000000e+00 : f32
    %cst_6 = arith.constant 6.000000e+00 : f32
    %6 = vector.broadcast %cst_5 : f32 to vector<8x3xf32>
    %7 = arith.maximumf %6, %5 : vector<8x3xf32>
    %8 = vector.broadcast %cst_6 : f32 to vector<8x3xf32>
    %9 = arith.minimumf %8, %7 : vector<8x3xf32>
    %cst_7 = arith.constant 0.166666672 : f32
    %10 = vector.broadcast %cst_7 : f32 to vector<8x3xf32>
    %11 = arith.mulf %9, %10 : vector<8x3xf32>
    %c0_8 = arith.constant 0 : index
    %c0_9 = arith.constant 0 : index
    %12 = vector.load %arg4[%c0_8, %c0_9] : memref<8x3xf32, #tpu.memory_space<vmem>>, vector<8x3xf32>
    tpu.vector_store %arg4[%c0_8, %c0_9], %11 {strides = array<i32>} : memref<8x3xf32, #tpu.memory_space<vmem>>, vector<8x3xf32>,
    return
  }
  func.func @transform_0(%arg0: i32) -> (i32, i32) {
    %c0_i32 = arith.constant 0 : i32
    %c0_i32_0 = arith.constant 0 : i32
    return %arg0, %c0_i32 : i32, i32
  }
  func.func @transform_1(%arg0: i32) -> (i32, i32) {
    %c0_i32 = arith.constant 0 : i32
    %c0_i32_0 = arith.constant 0 : i32
    %c0_i32_1 = arith.constant 0 : i32
    return %c0_i32, %c0_i32_0 : i32, i32
  }
  func.func @transform_2(%arg0: i32) -> (i32, i32) {
    %c0_i32 = arith.constant 0 : i32
    %c0_i32_0 = arith.constant 0 : i32
    %c0_i32_1 = arith.constant 0 : i32
    return %c0_i32, %c0_i32_0 : i32, i32
  }
  func.func @transform_3(%arg0: i32) -> (i32, i32) {
    %c0_i32 = arith.constant 0 : i32
    %c0_i32_0 = arith.constant 0 : i32
    return %arg0, %c0_i32 : i32, i32
  }
}

</mosaic_0001>

<bundles_post_ra>
// kernel: forward.1
= control target key start
LH: loop header
LB: loop body
LE: loop exit
PB: predicated region body
PF: predicated region fallthrough
CT: control target
= control target key end

     0   :  { %8 = vsyncpa [#allocation3], 0  ;;  %v874_v2 = vmov 0.0|0.0   ;;  %vm875_vm0 = vmmov 0   ;;  %v876_v11 = vmov 0.0   ;;  %vm31_vm1 = vcmask 523264   ;;  %s1049_s0 = inlined_call_operand.vmem [shape: f32[1,64], index: 0, kind: input, shape index: {}]   ;;  %s1050_s1 = inlined_call_operand.vmem [shape: f32[64,3], index: 1, kind: input, shape index: {}]   ;;  %s1051_s2 = inlined_call_operand.vmem [shape: f32[1,3], index: 2, kind: input, shape index: {}]   ;;  %s1052_s3 = inlined_call_operand.hbm [shape: f32[1,3], index: 3, kind: output, shape index: {}]  }
   0x1   :  { %v16_v0 = vld [vmem:[%s1050_s1] sm:$0xff]  ;;  %v17_v1 = vld [vmem:[%s1050_s1 + $0x8] sm:$0xff]  ;;  %762 = vmatprep.subr.bf16.mxu1 %v874_v2  ;;  %798 = vmatprep.subr.bf16.mxu0 %v874_v2  ;;  %v18_v5 = vld [vmem:[%s1050_s1 + $0x10] sm:$0xff]  ;;  %vm575_vm2 = vcmask 23552  }
   0x2   :  { %v36_v3 = vand.u32 4294901760, %v16_v0  ;;  %v39_v4 = vand.u32 4294901760, %v17_v1  ;;  %v19_v6 = vld [vmem:[%s1050_s1 + $0x18] sm:$0xff]  ;;  %v20_v7 = vld [vmem:[%s1050_s1 + $0x20] sm:$0xff]  ;;  %v42_v8 = vand.u32 4294901760, %v18_v5  ;;  %v21_v10 = vld [vmem:[%s1050_s1 + $0x28] sm:$0xff]  ;;  %664 = vmatprep.mubr.msk.f32.mxu1 %vm875_vm0, %v876_v11  ;;  %721 = vmatprep.mubr.msk.f32.mxu0 %vm875_vm0, %v876_v11 }
   0x3   :  { %v45_v9 = vand.u32 4294901760, %v19_v6  ;;  %v48_v16 = vand.u32 4294901760, %v20_v7  ;;  %v51_v17 = vand.u32 4294901760, %v21_v10  ;;  %v22_v18 = vld [vmem:[%s1050_s1 + $0x30] sm:$0xff]  ;;  %v23_v19 = vld [vmem:[%s1050_s1 + $0x38] sm:$0xff]  ;;  %v15_v20 = vld [vmem:[%s1049_s0] sm:$0xff] }
   0x4   :  { %v924_v12 = vpack.c.bf16 %v39_v4, %v36_v3  ;;  %v926_v13 = vsub.f32 %v16_v0, %v36_v3  ;;  %v928_v14 = vsub.f32 %v17_v1, %v39_v4  ;;  %v930_v15 = vsub.f32 %v18_v5, %v42_v8 }
   0x5   :  { %v943_v21 = vpack.c.bf16 %v45_v9, %v42_v8  ;;  %v945_v22 = vsub.f32 %v19_v6, %v45_v9  ;;  %v54_v25 = vand.u32 4294901760, %v22_v18  ;;  %v57_v26 = vand.u32 4294901760, %v23_v19 }
   0x6   :  { %764 = vmatpush3.bf16.msra.mxu1 %v924_v12  ;;  %800 = vmatpush3.bf16.msra.mxu0 %v924_v12  ;;  %v121_v23 = vand.u32 4294901760, %v926_v13  ;;  %v128_v24 = vand.u32 4294901760, %v928_v14  ;;  %v33_v27 = vsel %vm31_vm1, %v15_v20, 0  ;;  %v951_v28 = vpack.c.bf16 %v51_v17, %v48_v16 }
   0x7   :  { %765 = vmatprep.subr.bf16.mxu1 %v874_v2  ;;  %801 = vmatprep.subr.bf16.mxu0 %v874_v2  ;;  %v953_v29 = vsub.f32 %v20_v7, %v48_v16  ;;  %v955_v30 = vand.u32 4294901760, %v33_v27  ;;  %v135_v31 = vand.u32 4294901760, %v930_v15  ;;  %v960_v32 = vsub.f32 %v21_v10, %v51_v17  ;;  %v593_v10 = vld [vmem:[%s1051_s2] ss:$0 sm:$0xff] }
   0x8   :  { %v122_v33 = vsub.f32 %v926_v13, %v121_v23  ;;  %v129_v34 = vsub.f32 %v928_v14, %v128_v24  ;;  %v142_v35 = vand.u32 4294901760, %v945_v22  ;;  %v970_v37 = vpack.c.bf16 %v57_v26, %v54_v25 }
   0x9   :  { %v968_v36 = vsub.f32 %v33_v27, %v955_v30  ;;  %v972_v38 = vsub.f32 %v22_v18, %v54_v25  ;;  %v974_v39 = vsub.f32 %v23_v19, %v57_v26  ;;  %v136_v41 = vsub.f32 %v930_v15, %v135_v31 }
   0xa   :  { %767 = vmatpush3.bf16.msra.mxu1 %v943_v21  ;;  %803 = vmatpush3.bf16.msra.mxu0 %v943_v21  ;;  %v149_v42 = vand.u32 4294901760, %v953_v29  ;;  %v123_v43 = vand.u32 4294901760, %v122_v33  ;;  %v130_v44 = vand.u32 4294901760, %v129_v34  ;;  %v143_v45 = vsub.f32 %v945_v22, %v142_v35 }
   0xb   :  { %768 = vmatprep.subr.bf16.mxu1 %v874_v2  ;;  %804 = vmatprep.subr.bf16.mxu0 %v874_v2  ;;  %v110_v40 = vand.u32 4294901760, %v968_v36  ;;  %v156_v46 = vand.u32 4294901760, %v960_v32  ;;  %v811_v48 = vpack.c.bf16 %v128_v24, %v121_v23  ;;  %v137_v50 = vand.u32 4294901760, %v136_v41 }
   0xc   :  { %v150_v51 = vsub.f32 %v953_v29, %v149_v42  ;;  %v163_v52 = vand.u32 4294901760, %v972_v38  ;;  %v775_v53 = vpack.c.bf16 %v130_v44, %v123_v43  ;;  %v144_v54 = vand.u32 4294901760, %v143_v45 }
   0xd   :  { %v111_v47 = vsub.f32 %v968_v36, %v110_v40  ;;  %v157_v55 = vsub.f32 %v960_v32, %v156_v46  ;;  %v170_v56 = vand.u32 4294901760, %v974_v39  ;;  %v814_v57 = vpack.c.bf16 %v142_v35, %v135_v31 }
   0xe   :  { %770 = vmatpush3.bf16.msra.mxu1 %v951_v28  ;;  %806 = vmatpush3.bf16.msra.mxu0 %v951_v28  ;;  %v151_v58 = vand.u32 4294901760, %v150_v51  ;;  %v778_v59 = vpack.c.bf16 %v144_v54, %v137_v50  ;;  %v164_v61 = vsub.f32 %v972_v38, %v163_v52  ;;  %v817_v0 = vpack.c.bf16 %v156_v46, %v149_v42 }
   0xf   :  { %771 = vmatprep.subr.bf16.mxu1 %v874_v2  ;;  %807 = vmatprep.subr.bf16.mxu0 %v874_v2  ;;  %v112_v49 = vand.u32 4294901760, %v111_v47  ;;  %v158_v60 = vand.u32 4294901760, %v157_v55  ;;  %v171_v62 = vsub.f32 %v974_v39, %v170_v56  ;;  %v820_v5 = vpack.c.bf16 %v170_v56, %v163_v52 }
  0x10   :  { %v165_v1 = vand.u32 4294901760, %v164_v61  ;;  %v787_v6 = vpack.c.bf16 %v928_v14, %v926_v13  ;;  %v790_v7 = vpack.c.bf16 %v945_v22, %v930_v15  ;;  %v793_v8 = vpack.c.bf16 %v960_v32, %v953_v29 }
  0x11   :  { %v781_v63 = vpack.c.bf16 %v158_v60, %v151_v58  ;;  %v172_v3 = vand.u32 4294901760, %v171_v62  ;;  %v796_v9 = vpack.c.bf16 %v974_v39, %v972_v38 }
  0x12   :  { %773 = vmatpush3.bf16.msra.mxu1 %v970_v37  ;;  %809 = vmatpush3.bf16.msra.mxu0 %v970_v37 }
  0x13   :  { %774 = vmatprep.subr.bf16.mxu1 %v874_v2  ;;  %810 = vmatprep.subr.bf16.mxu0 %v874_v2  ;;  %v784_v4 = vpack.c.bf16 %v172_v3, %v165_v1 }
  0x15   :  { %665 = vmatmul.mubr.f32.vlgmr.msra.gmra.mrb[0].mxu1 %v112_v49  ;;  %722 = vmatmul.mubr.f32.vlgmr.msra.gmra.mrb[0].mxu0 %v110_v40 }
  0x16   :  { %776 = vmatpush3.bf16.msra.mxu1 %v775_v53  ;;  %812 = vmatpush3.bf16.msra.mxu0 %v811_v48 }
  0x17   :  { %777 = vmatprep.subr.bf16.mxu1 %v874_v2  ;;  %813 = vmatprep.subr.bf16.mxu0 %v874_v2 }
  0x18   :  { %683 = vmatprep.mubr.msk.f32.mxu1 %vm875_vm0, %v876_v11  ;;  %740 = vmatprep.mubr.msk.f32.mxu0 %vm875_vm0, %v876_v11 }
  0x1a   :  { %779 = vmatpush3.bf16.msra.mxu1 %v778_v59  ;;  %815 = vmatpush3.bf16.msra.mxu0 %v814_v57 }
  0x1b   :  { %780 = vmatprep.subr.bf16.mxu1 %v874_v2  ;;  %816 = vmatprep.subr.bf16.mxu0 %v874_v2 }
  0x1e   :  { %782 = vmatpush3.bf16.msra.mxu1 %v781_v63  ;;  %818 = vmatpush3.bf16.msra.mxu0 %v817_v0 }
  0x1f   :  { %783 = vmatprep.subr.bf16.mxu1 %v874_v2  ;;  %819 = vmatprep.subr.bf16.mxu0 %v874_v2 }
  0x22   :  { %785 = vmatpush3.bf16.msra.mxu1 %v784_v4  ;;  %821 = vmatpush3.bf16.msra.mxu0 %v820_v5 }
  0x23   :  { %786 = vmatprep.subr.bf16.mxu1 %v874_v2  ;;  %822 = vmatprep.subr.bf16.mxu0 %v874_v2 }
  0x25   :  { %684 = vmatmul.mubr.f32.vlgmr.msra.gmra.mrb[0].mxu1 %v955_v30  ;;  %741 = vmatmul.mubr.f32.vlgmr.msra.gmra.mrb[0].mxu0 %v955_v30 }
  0x26   :  { %788 = vmatpush3.bf16.msra.mxu1 %v787_v6  ;;  %824 = vmatpush3.bf16.msra.mxu0 %v924_v12 }
  0x27   :  { %789 = vmatprep.subr.bf16.mxu1 %v874_v2  ;;  %825 = vmatprep.subr.bf16.mxu0 %v874_v2 }
  0x28   :  { %702 = vmatprep.mubr.msk.f32.mxu1 %vm875_vm0, %v876_v11  ;;  %759 = vmatprep.mubr.msk.f32.mxu0 %vm875_vm0, %v876_v11 }
  0x2a   :  { %791 = vmatpush3.bf16.msra.mxu1 %v790_v7  ;;  %827 = vmatpush3.bf16.msra.mxu0 %v943_v21 }
  0x2b   :  { %792 = vmatprep.subr.bf16.mxu1 %v874_v2  ;;  %828 = vmatprep.subr.bf16.mxu0 %v874_v2 }
  0x2e   :  { %794 = vmatpush3.bf16.msra.mxu1 %v793_v8  ;;  %830 = vmatpush3.bf16.msra.mxu0 %v951_v28 }
  0x2f   :  { %795 = vmatprep.subr.bf16.mxu1 %v874_v2  ;;  %831 = vmatprep.subr.bf16.mxu0 %v874_v2 }
  0x32   :  { %797 = vmatpush3.bf16.msra.mxu1 %v796_v9  ;;  %833 = vmatpush3.bf16.msra.mxu0 %v970_v37 }
  0x35   :  { %703 = vmatmul.mubr.f32.vlgmr.msra.gmra.mrb[0].mxu1 %v968_v36  ;;  %760 = vmatmul.mubr.f32.vlgmr.msra.gmra.mrb[0].mxu0 %v955_v30 }
 0x108   :  { %v313_v11 = vpop.f32.mrb[0].mxu1  ;;  %v568_v12 = vpop.f32.mrb[0].mxu0 }
 0x109   :  { %v834_v13 = vadd.f32 %v593_v10, %v313_v11  ;;  %v704_v14 = vpop.f32.mrb[1].mxu1  ;;  %v761_v15 = vpop.f32.mrb[1].mxu0 }
 0x10b   :  { %v835_v16 = vadd.f32 %v834_v13, %v568_v12 }
 0x10d   :  { %v572_v17 = vmax.f32 %v835_v16, 0.0 }
 0x10f   :  { %v573_v18 = vmin.f32 %v572_v17, 6.0 }
 0x111   :  { %v574_v2 = vmul.f32 0.16666667, %v573_v18 }
 0x113   :  { %576 = vst.msk [vmem:[#allocation2] sm:$0xff] %vm575_vm2, %v574_v2 }
 0x114   :  { %581 = vsyncadd [#allocation3], 112  ;;  %s877_s30 = smov [#allocation2]  }
 0x115   :  { %s582_s4 = sshll.u32 %s877_s30, 4  ;;  %s583_s4 = int_to_ptr.vmem [resolvable:$true] %s582_s4 }
 0x116   :  { %s850_s5 = scalar_lea.vmem %s583_s4, 16  ;;  %s854_s6 = scalar_lea.vmem %s583_s4, 128 }
 0x117   :  { %p851_p0 = scmp.ne.s32.totalorder %s583_s4, %s850_s5  ;;  %p855_p1 = scmp.lt.s32.totalorder %s583_s4, %s583_s4 }
 0x118   :  { %p856_p2 = scmp.lt.s32.totalorder %s854_s6, %s850_s5 }
 0x11a   :  { %p857_p3 = por %p856_p2, %p855_p1 }
 0x11c   :  { %p858_p4 = pnand %p857_p3, %p851_p0 }
 0x11e   :  { %861 = shalt.err (!%p858_p4)
}
 0x11f   :  { %s862_s8 = scalar_lea.hbm %s1052_s3, 16 }
 0x120   :  { %p863_p5 = scmp.ne.s32.totalorder %s1052_s3, %s862_s8  ;;  %p866_p6 = scmp.lt.u32.totalorder %s862_s8, %s1052_s3 }
 0x122   :  { %p868_p7 = pnand %p866_p6, %p863_p5 }
 0x124   :  { %871 = shalt.err (!%p868_p7)
}
 0x125   :  { %s878_s13 = smov 16   ;;  %s879_s14 = smov 1  }
 0x126   :  { %588 = dma.vmem_to_hbm [thread:$0]  %s583_s4, 16, %s1052_s3, [#allocation3], %s878_s13, %s878_s13, %s879_s14  }
 0x127   :  { %872 = dma.done.wait [#allocation3], 128  }
 0x128   :  { %873 = vsyncadd [#allocation3], 4294967168 }
 0x129   :  { %592 = vsyncpa [#allocation3], 1 }

</bundles_post_ra>
